<compile_context>
chip_gen: v7x
topology: tpu7x:2x2x1
jax: 0.10.0
libtpu: 0.0.40
codegen_flags: <defaults>
</compile_context>

<pallas_src>
import functools

import jax
import jax.numpy as jnp
import numpy as np
from jax.experimental import pallas as pl
from jax.experimental.pallas import tpu as pltpu


def walk_mlp_kernel(x_ref, al_ref,
                    w1b_ref, b1e_ref,
                    w2_ref, b2_ref,
                    w3_ref, b3_ref,
                    out_ref):
    w_dtype = w1b_ref.dtype
    x_in = x_ref[...]                                     # (TB, dzp) io dtype (bf16/f32)
    al = al_ref[...].astype(jnp.float32)                  # (TB, 1)  == alpha[:, 0:1]

    # layer 1 (embed path + W1a already folded into b1_eff):  h = x @ W1b + b1_eff
    h = jnp.dot(x_in.astype(w_dtype), w1b_ref[...],
                preferred_element_type=jnp.float32) + b1e_ref[...]
    h = jnp.where(h > 0, h, 0.2 * h)                      # LeakyReLU(0.2), f32

    # layer 2 : Linear(dz, dz)
    h = jnp.dot(h.astype(w_dtype), w2_ref[...],
                preferred_element_type=jnp.float32) + b2_ref[...]
    h = jnp.where(h > 0, h, 0.2 * h)                      # LeakyReLU(0.2), f32

    # layer 3 : Linear(dz, dz)
    out2 = jnp.dot(h.astype(w_dtype), w3_ref[...],
                   preferred_element_type=jnp.float32) + b3_ref[...]

    # al * out2 / ||out2||_2  ==  out2 * (al * rsqrt(sum(out2^2)))  (f32, EUP rsqrt)
    scale = al * jax.lax.rsqrt(jnp.sum(out2 * out2, axis=1, keepdims=True))
    z_new = x_in.astype(jnp.float32) + out2 * scale
    out_ref[...] = z_new.astype(out_ref.dtype)


def _round_up(x, m):
    return ((x + m - 1) // m) * m


def prepare_params(params, direction_row, *, compute_dtype=jnp.bfloat16):
    """One-time preprocessing (out of the hot path):
       * transpose weights to (in, out), split W1 into embed-part / x-part,
       * fold the batch-invariant embed path into an effective layer-1 bias,
       * zero-pad the feature dim to a multiple of 128 (lane-dense kernel I/O),
       * cast weights to the compute dtype (bf16 fast path / f32 exact path).
       Biases stay f32 (added directly to the f32 MXU accumulator)."""
    dz = int(params["w2"].shape[0])
    dz_pad = _round_up(max(dz, 128), 128)

    we_t = jnp.asarray(params["embed_w"], jnp.float32).T          # (10, dz)
    be = jnp.asarray(params["embed_b"], jnp.float32).reshape(1, dz)
    w1_t = jnp.asarray(params["w1"], jnp.float32).T               # (2dz, dz)
    w1a_t, w1b_t = w1_t[:dz], w1_t[dz:]                           # emb-part / x-part
    b1 = jnp.asarray(params["b1"], jnp.float32).reshape(1, dz)

    emb = jnp.asarray(direction_row, jnp.float32) @ we_t + be     # (1, dz) batch-invariant
    b1_eff = emb @ w1a_t + b1                                     # (1, dz)

    def pad_w(w):   # (dz, dz) -> (dz_pad, dz_pad), zero pad, compute dtype
        return jnp.pad(w, ((0, dz_pad - dz), (0, dz_pad - dz))).astype(compute_dtype)

    def pad_b(b):   # (1, dz) -> (1, dz_pad), zero pad, keep f32
        return jnp.pad(b, ((0, 0), (0, dz_pad - dz))).astype(jnp.float32)

    return {
        "w1b": pad_w(w1b_t),
        "b1_eff": pad_b(b1_eff),
        "w2": pad_w(jnp.asarray(params["w2"], jnp.float32).T),
        "b2": pad_b(jnp.asarray(params["b2"], jnp.float32).reshape(1, dz)),
        "w3": pad_w(jnp.asarray(params["w3"], jnp.float32).T),
        "b3": pad_b(jnp.asarray(params["b3"], jnp.float32).reshape(1, dz)),
    }


@functools.partial(jax.jit, static_argnames=("block_rows",))
def walk_mlp_multi_z(inp, alpha, prepped, *, block_rows=4096):
    """inp: (B, dz) latent, alpha: (B, Nsliders), prepped: output of prepare_params."""
    B, dz = inp.shape
    dz_pad = prepped["w1b"].shape[0]
    io_dtype = prepped["w1b"].dtype
    io_item = jnp.dtype(io_dtype).itemsize

    al = alpha[:, 0:1].astype(jnp.float32)                # module only uses slider 0
    x_pad = jnp.pad(inp.astype(io_dtype), ((0, 0), (0, dz_pad - dz)))

    # ---- batch-tile selection (all static at trace time) -------------------
    # VMEM accounting: double-buffered x/out batch tiles + alpha, plus the
    # resident weights/biases which the pipeline still double-buffers.
    weight_vmem = 2 * (3 * dz_pad * dz_pad * io_item + 4 * dz_pad * 4)
    per_row = 4 * dz_pad * io_item + 8                    # 2 bufs * (x + out) + alpha
    tile_budget = max(16 * 1024 * 1024 - weight_vmem, 2 * 1024 * 1024)
    tb_cap = max(8, (tile_budget // per_row) // 8 * 8)

    tb = min(block_rows, tb_cap, B)
    if B >= 16:                                           # >=2 grid steps -> v7x megacore
        tb = min(tb, max(8, (B // 2) // 8 * 8))
    if tb < B:
        tb = max(8, (tb // 8) * 8)                        # (8, 128) tiling constraint
    grid = (pl.cdiv(B, tb),)

    vmem_limit = int(min(max(32 << 20, 2 * (weight_vmem + tb * per_row)), 48 << 20))

    batch_spec = pl.BlockSpec((tb, dz_pad), lambda i: (i, 0))
    alpha_spec = pl.BlockSpec((tb, 1), lambda i: (i, 0))

    def resident(shape):
        # Full block, constant index map -> DMA'd once, VMEM-resident across
        # grid steps.  NOTE: on v7x with very large dz, weight specs could use
        # pipeline_mode=pl.Buffered(1) to drop the unused second weight buffer.
        return pl.BlockSpec(shape, lambda i: (0, 0))

    in_specs = [batch_spec, alpha_spec,
                resident((dz_pad, dz_pad)), resident((1, dz_pad)),
                resident((dz_pad, dz_pad)), resident((1, dz_pad)),
                resident((dz_pad, dz_pad)), resident((1, dz_pad))]

    out_pad = pl.pallas_call(
        walk_mlp_kernel,
        out_shape=jax.ShapeDtypeStruct((B, dz_pad), io_dtype),
        grid_spec=pl.GridSpec(grid=grid, in_specs=in_specs, out_specs=batch_spec),
        input_output_aliases={0: 0},                      # z_new reuses padded-x buffer
        compiler_params=pltpu.CompilerParams(
            dimension_semantics=("parallel",),
            vmem_limit_bytes=vmem_limit),
    )(x_pad, al,
      prepped["w1b"], prepped["b1_eff"],
      prepped["w2"], prepped["b2"],
      prepped["w3"], prepped["b3"])

    return out_pad[:, :dz].astype(inp.dtype)


def init_params(key, dim_z):
    """Deterministic synthetic init (uniform, roughly PyTorch-scale)."""
    def lin(k, out_f, in_f):
        kw, kb = jax.random.split(k)
        bound = 1.0 / np.sqrt(in_f)
        w = jax.random.uniform(kw, (out_f, in_f), jnp.float32, -bound, bound)
        b = jax.random.uniform(kb, (out_f,), jnp.float32, -bound, bound)
        return w, b

    k0, k1, k2, k3 = jax.random.split(key, 4)
    ew, eb = lin(k0, dim_z, 10)
    w1, b1 = lin(k1, dim_z, 2 * dim_z)
    w2, b2 = lin(k2, dim_z, dim_z)
    w3, b3 = lin(k3, dim_z, dim_z)
    return {"embed_w": ew, "embed_b": eb,
            "w1": w1, "b1": b1, "w2": w2, "b2": b2, "w3": w3, "b3": b3}


def reference(inp, alpha, direction_row, params):
    """Pure-JAX f32 reference of the PyTorch forward."""
    B, dz = inp.shape
    al = alpha[:, 0:1]
    d = jnp.tile(direction_row, (B, 1))
    emb = d @ params["embed_w"].T + params["embed_b"]
    h = jnp.concatenate([emb, inp], axis=1) @ params["w1"].T + params["b1"]
    h = jnp.where(h > 0, h, 0.2 * h)
    h = h @ params["w2"].T + params["b2"]
    h = jnp.where(h > 0, h, 0.2 * h)
    out2 = h @ params["w3"].T + params["b3"]
    out2 = al * out2 / jnp.linalg.norm(out2, axis=1, keepdims=True)
    return inp + out2


if __name__ == "__main__":
    B, dim_z, Nsliders = 8, 32, 2
    key = jax.random.PRNGKey(0)
    k_in, k_al, k_par, k_in2, k_al2 = jax.random.split(key, 5)

    x = jax.random.normal(k_in, (B, dim_z), jnp.float32)           # latent z
    alpha = jax.random.normal(k_al, (B, Nsliders), jnp.float32)    # slider strengths
    direction_row = jnp.zeros((1, 10), jnp.float32).at[0, 0].set(1.0)
    params = init_params(k_par, dim_z)
    ref = reference(x, alpha, direction_row, params)

    # 1) Exact-semantics path: f32 I/O + f32 weights (tight tolerance).
    prepped_f32 = prepare_params(params, direction_row, compute_dtype=jnp.float32)
    z_f32 = jax.block_until_ready(walk_mlp_multi_z(x, alpha, prepped_f32))
    np.testing.assert_allclose(np.asarray(z_f32), np.asarray(ref), rtol=1e-5, atol=1e-5)

    # 2) Fast path: bf16 I/O + bf16 weights, f32 accumulation (v6e/v7x native).
    prepped_bf16 = prepare_params(params, direction_row, compute_dtype=jnp.bfloat16)
    z_bf16 = jax.block_until_ready(walk_mlp_multi_z(x, alpha, prepped_bf16))
    np.testing.assert_allclose(np.asarray(z_bf16), np.asarray(ref), rtol=5e-2, atol=5e-2)

    # 3) Multi-tile path (grid >= 2 steps -> megacore split, aliased output).
    B2 = 256
    x2 = jax.random.normal(k_in2, (B2, dim_z), jnp.float32)
    alpha2 = jax.random.normal(k_al2, (B2, Nsliders), jnp.float32)
    ref2 = reference(x2, alpha2, direction_row, params)
    z2 = jax.block_until_ready(walk_mlp_multi_z(x2, alpha2, prepped_f32))
    np.testing.assert_allclose(np.asarray(z2), np.asarray(ref2), rtol=1e-5, atol=1e-5)

    print("KERNEL_OK")
</pallas_src>

<mosaic_0001>
module attributes {stable_mosaic.version = 11 : i64} {
  func.func @walk_mlp_kernel(%arg0: i32, %arg1: memref<8x128xf32, #tpu.memory_space<vmem>>, %arg2: memref<8x1xf32, #tpu.memory_space<vmem>>, %arg3: memref<128x128xf32, #tpu.memory_space<vmem>>, %arg4: memref<1x128xf32, #tpu.memory_space<vmem>>, %arg5: memref<128x128xf32, #tpu.memory_space<vmem>>, %arg6: memref<1x128xf32, #tpu.memory_space<vmem>>, %arg7: memref<128x128xf32, #tpu.memory_space<vmem>>, %arg8: memref<1x128xf32, #tpu.memory_space<vmem>>, %arg9: memref<8x128xf32, #tpu.memory_space<vmem>>) attributes {dimension_semantics = [#tpu.dimension_semantics<parallel>], iteration_bounds = array<i64: 1>, scalar_prefetch = 0 : i64, scratch_operands = 0 : i64, tpu.core_type = #tpu.core_type<tc>, window_params = [{transform_indices = @transform_0, window_bounds = array<i64: 8, 128>}, {transform_indices = @transform_1, window_bounds = array<i64: 8, 1>}, {pipeline_mode = #tpu.pipeline_mode<synchronous>, transform_indices = @transform_2, window_bounds = array<i64: 128, 128>}, {pipeline_mode = #tpu.pipeline_mode<synchronous>, transform_indices = @transform_3, window_bounds = array<i64: 1, 128>}, {pipeline_mode = #tpu.pipeline_mode<synchronous>, transform_indices = @transform_4, window_bounds = array<i64: 128, 128>}, {pipeline_mode = #tpu.pipeline_mode<synchronous>, transform_indices = @transform_5, window_bounds = array<i64: 1, 128>}, {pipeline_mode = #tpu.pipeline_mode<synchronous>, transform_indices = @transform_6, window_bounds = array<i64: 128, 128>}, {pipeline_mode = #tpu.pipeline_mode<synchronous>, transform_indices = @transform_7, window_bounds = array<i64: 1, 128>}, {transform_indices = @transform_8, window_bounds = array<i64: 8, 128>}]} {
    %c0 = arith.constant 0 : index
    %c0_0 = arith.constant 0 : index
    %0 = vector.load %arg1[%c0, %c0_0] : memref<8x128xf32, #tpu.memory_space<vmem>>, vector<8x128xf32>
    %c0_1 = arith.constant 0 : index
    %c0_2 = arith.constant 0 : index
    %1 = vector.load %arg2[%c0_1, %c0_2] : memref<8x1xf32, #tpu.memory_space<vmem>>, vector<8x1xf32>
    %c0_3 = arith.constant 0 : index
    %c0_4 = arith.constant 0 : index
    %2 = vector.load %arg3[%c0_3, %c0_4] : memref<128x128xf32, #tpu.memory_space<vmem>>, vector<128x128xf32>
    %cst = arith.constant dense<0.000000e+00> : vector<8x128xf32>
    %3 = tpu.matmul %0, %2, %cst {dimension_numbers = #tpu.dot_dimension_numbers<[1], [0], [0], [1], [0, 0, 1, 1], [], []>} : vector<8x128xf32>, vector<128x128xf32>, vector<8x128xf32> -> vector<8x128xf32>
    %c0_5 = arith.constant 0 : index
    %c0_6 = arith.constant 0 : index
    %4 = vector.load %arg4[%c0_5, %c0_6] : memref<1x128xf32, #tpu.memory_space<vmem>>, vector<1x128xf32>
    %5 = vector.broadcast %4 : vector<1x128xf32> to vector<8x128xf32>
    %6 = arith.addf %3, %5 : vector<8x128xf32>
    %cst_7 = arith.constant 0.000000e+00 : f32
    %7 = vector.broadcast %cst_7 : f32 to vector<8x128xf32>
    %8 = arith.cmpf ogt, %6, %7 : vector<8x128xf32>
    %cst_8 = arith.constant 2.000000e-01 : f32
    %9 = vector.broadcast %cst_8 : f32 to vector<8x128xf32>
    %10 = arith.mulf %9, %6 : vector<8x128xf32>
    %11 = arith.select %8, %6, %10 : vector<8x128xi1>, vector<8x128xf32>
    %c0_9 = arith.constant 0 : index
    %c0_10 = arith.constant 0 : index
    %12 = vector.load %arg5[%c0_9, %c0_10] : memref<128x128xf32, #tpu.memory_space<vmem>>, vector<128x128xf32>
    %cst_11 = arith.constant dense<0.000000e+00> : vector<8x128xf32>
    %13 = tpu.matmul %11, %12, %cst_11 {dimension_numbers = #tpu.dot_dimension_numbers<[1], [0], [0], [1], [0, 0, 1, 1], [], []>} : vector<8x128xf32>, vector<128x128xf32>, vector<8x128xf32> -> vector<8x128xf32>
    %c0_12 = arith.constant 0 : index
    %c0_13 = arith.constant 0 : index
    %14 = vector.load %arg6[%c0_12, %c0_13] : memref<1x128xf32, #tpu.memory_space<vmem>>, vector<1x128xf32>
    %15 = vector.broadcast %14 : vector<1x128xf32> to vector<8x128xf32>
    %16 = arith.addf %13, %15 : vector<8x128xf32>
    %cst_14 = arith.constant 0.000000e+00 : f32
    %17 = vector.broadcast %cst_14 : f32 to vector<8x128xf32>
    %18 = arith.cmpf ogt, %16, %17 : vector<8x128xf32>
    %cst_15 = arith.constant 2.000000e-01 : f32
    %19 = vector.broadcast %cst_15 : f32 to vector<8x128xf32>
    %20 = arith.mulf %19, %16 : vector<8x128xf32>
    %21 = arith.select %18, %16, %20 : vector<8x128xi1>, vector<8x128xf32>
    %c0_16 = arith.constant 0 : index
    %c0_17 = arith.constant 0 : index
    %22 = vector.load %arg7[%c0_16, %c0_17] : memref<128x128xf32, #tpu.memory_space<vmem>>, vector<128x128xf32>
    %cst_18 = arith.constant dense<0.000000e+00> : vector<8x128xf32>
    %23 = tpu.matmul %21, %22, %cst_18 {dimension_numbers = #tpu.dot_dimension_numbers<[1], [0], [0], [1], [0, 0, 1, 1], [], []>} : vector<8x128xf32>, vector<128x128xf32>, vector<8x128xf32> -> vector<8x128xf32>
    %c0_19 = arith.constant 0 : index
    %c0_20 = arith.constant 0 : index
    %24 = vector.load %arg8[%c0_19, %c0_20] : memref<1x128xf32, #tpu.memory_space<vmem>>, vector<1x128xf32>
    %25 = vector.broadcast %24 : vector<1x128xf32> to vector<8x128xf32>
    %26 = arith.addf %23, %25 : vector<8x128xf32>
    %27 = arith.mulf %26, %26 : vector<8x128xf32>
    %cst_21 = arith.constant dense<0.000000e+00> : vector<8xf32>
    %28 = vector.multi_reduction <add>, %27, %cst_21 [1] : vector<8x128xf32> to vector<8xf32>
    %29 = vector.shape_cast %28 : vector<8xf32> to vector<8x1xf32>
    %30 = math.rsqrt %29 : vector<8x1xf32>
    %31 = arith.mulf %1, %30 : vector<8x1xf32>
    %32 = vector.broadcast %31 : vector<8x1xf32> to vector<8x128xf32>
    %33 = arith.mulf %26, %32 : vector<8x128xf32>
    %34 = arith.addf %0, %33 : vector<8x128xf32>
    %c0_22 = arith.constant 0 : index
    %c0_23 = arith.constant 0 : index
    %35 = vector.load %arg9[%c0_22, %c0_23] : memref<8x128xf32, #tpu.memory_space<vmem>>, vector<8x128xf32>
    tpu.vector_store %arg9[%c0_22, %c0_23], %34 {strides = array<i32>} : memref<8x128xf32, #tpu.memory_space<vmem>>, vector<8x128xf32>,
    return
  }
  func.func @transform_0(%arg0: i32) -> (i32, i32) {
    %c0_i32 = arith.constant 0 : i32
    %c0_i32_0 = arith.constant 0 : i32
    return %arg0, %c0_i32 : i32, i32
  }
  func.func @transform_1(%arg0: i32) -> (i32, i32) {
    %c0_i32 = arith.constant 0 : i32
    %c0_i32_0 = arith.constant 0 : i32
    return %arg0, %c0_i32 : i32, i32
  }
  func.func @transform_2(%arg0: i32) -> (i32, i32) {
    %c0_i32 = arith.constant 0 : i32
    %c0_i32_0 = arith.constant 0 : i32
    %c0_i32_1 = arith.constant 0 : i32
    return %c0_i32, %c0_i32_0 : i32, i32
  }
  func.func @transform_3(%arg0: i32) -> (i32, i32) {
    %c0_i32 = arith.constant 0 : i32
    %c0_i32_0 = arith.constant 0 : i32
    %c0_i32_1 = arith.constant 0 : i32
    return %c0_i32, %c0_i32_0 : i32, i32
  }
  func.func @transform_4(%arg0: i32) -> (i32, i32) {
    %c0_i32 = arith.constant 0 : i32
    %c0_i32_0 = arith.constant 0 : i32
    %c0_i32_1 = arith.constant 0 : i32
    return %c0_i32, %c0_i32_0 : i32, i32
  }
  func.func @transform_5(%arg0: i32) -> (i32, i32) {
    %c0_i32 = arith.constant 0 : i32
    %c0_i32_0 = arith.constant 0 : i32
    %c0_i32_1 = arith.constant 0 : i32
    return %c0_i32, %c0_i32_0 : i32, i32
  }
  func.func @transform_6(%arg0: i32) -> (i32, i32) {
    %c0_i32 = arith.constant 0 : i32
    %c0_i32_0 = arith.constant 0 : i32
    %c0_i32_1 = arith.constant 0 : i32
    return %c0_i32, %c0_i32_0 : i32, i32
  }
  func.func @transform_7(%arg0: i32) -> (i32, i32) {
    %c0_i32 = arith.constant 0 : i32
    %c0_i32_0 = arith.constant 0 : i32
    %c0_i32_1 = arith.constant 0 : i32
    return %c0_i32, %c0_i32_0 : i32, i32
  }
  func.func @transform_8(%arg0: i32) -> (i32, i32) {
    %c0_i32 = arith.constant 0 : i32
    %c0_i32_0 = arith.constant 0 : i32
    return %arg0, %c0_i32 : i32, i32
  }
}

</mosaic_0001>

<bundles_post_ra>
// kernel: walk_mlp_multi_z.1
= control target key start
LH: loop header
LB: loop body
LE: loop exit
PB: predicated region body
PF: predicated region fallthrough
CT: control target
= control target key end

     0   :  { %13 = vsyncpa [#allocation3], 0  ;;  %s847_s0 = inlined_call_operand.vmem [shape: f32[8,128], index: 0, kind: input, shape index: {}, may-alias: {0,8}]   ;;  %s848_s1 = inlined_call_operand.vmem [shape: f32[8,1], index: 1, kind: input, shape index: {}]   ;;  %s849_s2 = inlined_call_operand.hbm [shape: f32[128,128], index: 2, kind: input, shape index: {}]   ;;  %s850_s3 = inlined_call_operand.vmem [shape: f32[1,128], index: 3, kind: input, shape index: {}]   ;;  %s851_s4 = inlined_call_operand.hbm [shape: f32[128,128], index: 4, kind: input, shape index: {}]   ;;  %s852_s5 = inlined_call_operand.vmem [shape: f32[1,128], index: 5, kind: input, shape index: {}]   ;;  %s853_s6 = inlined_call_operand.hbm [shape: f32[128,128], index: 6, kind: input, shape index: {}]   ;;  %s854_s7 = inlined_call_operand.vmem [shape: f32[1,128], index: 7, kind: input, shape index: {}]   ;;  %s855_s8 = inlined_call_operand.vmem [shape: f32[8,128], index: 8, kind: output, shape index: {}, may-alias: {0,8}]  }
   0x1   :  { %14 = vsyncpa [#allocation5], 0  ;;  %s689_s27 = smov [#allocation4]   ;;  %s690_s29 = smov [#allocation2]  }
   0x2   :  { %s38_s28 = sshll.u32 %s689_s27, 4  ;;  %s24_s30 = sshll.u32 %s690_s29, 4  ;;  %s39_s28 = int_to_ptr.vmem [resolvable:$true] %s38_s28  ;;  %s743_s30 = int_to_ptr.vmem [resolvable:$true] %s24_s30 }
   0x3   :  { %s619_s11 = scalar_lea.hbm %s851_s4, 2048 }
   0x4   :  { %p620_p0 = scmp.ne.s32.totalorder %s851_s4, %s619_s11  ;;  %p623_p1 = scmp.lt.u32.totalorder %s619_s11, %s851_s4 }
   0x6   :  { %p625_p2 = pnand %p623_p1, %p620_p0 }
   0x8   :  { %628 = shalt.err (!%p625_p2)
}
   0x9   :  { %s629_s16 = scalar_lea.vmem %s39_s28, 2048  ;;  %p634_p4 = scmp.lt.s32.totalorder %s39_s28, %s39_s28 }
   0xa   :  { %p630_p3 = scmp.ne.s32.totalorder %s39_s28, %s629_s16  ;;  %p635_p5 = scmp.lt.s32.totalorder %s629_s16, %s629_s16 }
   0xc   :  { %p636_p6 = por %p635_p5, %p634_p4 }
   0xe   :  { %p637_p7 = pnand %p636_p6, %p630_p3 }
  0x10   :  { %640 = shalt.err (!%p637_p7)
}
  0x11   :  { %s691_s17 = smov 128   ;;  %s692_s18 = smov 8  }
  0x12   :  { %44 = dma.hbm_to_vmem [thread:$0]  %s851_s4, 2048, %s39_s28, [#allocation5], %s691_s17, %s691_s17, %s692_s18  }
  0x13   :  { %s641_s23 = scalar_lea.hbm %s849_s2, 2048 }
  0x14   :  { %p642_p8 = scmp.ne.s32.totalorder %s849_s2, %s641_s23  ;;  %p645_p9 = scmp.lt.u32.totalorder %s641_s23, %s849_s2 }
  0x16   :  { %p647_p10 = pnand %p645_p9, %p642_p8 }
  0x18   :  { %650 = shalt.err (!%p647_p10)
}
  0x19   :  { %s651_s29 = scalar_lea.vmem %s743_s30, 2048  ;;  %p656_p12 = scmp.lt.s32.totalorder %s743_s30, %s743_s30 }
  0x1a   :  { %p652_p11 = scmp.ne.s32.totalorder %s743_s30, %s651_s29  ;;  %p657_p13 = scmp.lt.s32.totalorder %s651_s29, %s651_s29 }
  0x1c   :  { %p658_p0 = por %p657_p13, %p656_p12 }
  0x1e   :  { %p659_p1 = pnand %p658_p0, %p652_p11 }
  0x20   :  { %662 = shalt.err (!%p659_p1)
}
  0x21   :  { %30 = dma.hbm_to_vmem [thread:$0]  %s849_s2, 2048, %s743_s30, [#allocation3], %s691_s17, %s691_s17, %s692_s18  }
  0x22   :  { %s693_s9 = smov [#allocation6]   ;;  %s663_s13 = scalar_lea.hbm %s853_s6, 2048 }
  0x23   :  { %s52_s10 = sshll.u32 %s693_s9, 4  ;;  %p664_p2 = scmp.ne.s32.totalorder %s853_s6, %s663_s13  ;;  %s53_s10 = int_to_ptr.vmem [resolvable:$true] %s52_s10 }
  0x24   :  { %p667_p3 = scmp.lt.u32.totalorder %s663_s13, %s853_s6 }
  0x26   :  { %p669_p4 = pnand %p667_p3, %p664_p2 }
  0x28   :  { %672 = shalt.err (!%p669_p4)
}
  0x29   :  { %s673_s20 = scalar_lea.vmem %s53_s10, 2048  ;;  %p678_p6 = scmp.lt.s32.totalorder %s53_s10, %s53_s10 }
  0x2a   :  { %p674_p5 = scmp.ne.s32.totalorder %s53_s10, %s673_s20  ;;  %p679_p7 = scmp.lt.s32.totalorder %s673_s20, %s673_s20 }
  0x2c   :  { %p680_p8 = por %p679_p7, %p678_p6 }
  0x2e   :  { %p681_p9 = pnand %p680_p8, %p674_p5 }
  0x30   :  { %684 = shalt.err (!%p681_p9)
}
  0x31   :  { %58 = dma.hbm_to_vmem [thread:$0]  %s853_s6, 2048, %s53_s10, [#allocation5], %s691_s17, %s691_s17, %s692_s18  }
  0x32   :  { %685 = dma.done.wait [#allocation3], 2048  }
  0x33   :  { %686 = vsyncadd [#allocation3], 4294965248 }
  0x34   :  { %687 = dma.done.wait [#allocation5], 4096  }
  0x35   :  { %688 = vsyncadd [#allocation5], 4294963200  ;;  %v694_v0 = vmov 0.0|0.0   ;;  %vm695_vm0 = vmmov 0   ;;  %v696_v1 = vmov 0.0   ;;  %v72_v2 = vld [vmem:[#allocation2] sm:$0xff] }
  0x36   :  { %535 = vmatprep.subr.bf16.mxu0 %v694_v0  ;;  %462 = vmatprep.mubr.msk.f32.mxu0 %vm695_vm0, %v696_v1  ;;  %v73_v3 = vld [vmem:[#allocation2 + $0x8] sm:$0xff]  ;;  %v74_v4 = vld [vmem:[#allocation2 + $0x10] sm:$0xff]  ;;  %v75_v6 = vld [vmem:[#allocation2 + $0x18] sm:$0xff] }
  0x37   :  { %559 = vmatprep.subr.bf16.mxu1 %v694_v0  ;;  %497 = vmatprep.mubr.msk.f32.mxu1 %vm695_vm0, %v696_v1  ;;  %v536_v5 = vpack.c.bf16 %v73_v3, %v72_v2  ;;  %v539_v7 = vpack.c.bf16 %v75_v6, %v74_v4  ;;  %v76_v8 = vld [vmem:[#allocation2 + $0x20] sm:$0xff]  ;;  %v77_v9 = vld [vmem:[#allocation2 + $0x28] sm:$0xff]  ;;  %v170_v12 = vld [vmem:[#allocation4 + $0x10] sm:$0xff] }
  0x38   :  { %v168_v10 = vld [vmem:[#allocation4] sm:$0xff]  ;;  %v169_v11 = vld [vmem:[#allocation4 + $0x8] sm:$0xff]  ;;  %v171_v13 = vld [vmem:[#allocation4 + $0x18] sm:$0xff]  ;;  %v542_v14 = vpack.c.bf16 %v77_v9, %v76_v8 }
  0x39   :  { %537 = vmatpush3.bf16.msra.mxu0 %v536_v5  ;;  %v560_v15 = vpack.c.bf16 %v169_v11, %v168_v10  ;;  %v78_v16 = vld [vmem:[#allocation2 + $0x30] sm:$0xff]  ;;  %v79_v17 = vld [vmem:[#allocation2 + $0x38] sm:$0xff]  ;;  %v563_v18 = vpack.c.bf16 %v171_v13, %v170_v12  ;;  %v172_v19 = vld [vmem:[#allocation4 + $0x20] sm:$0xff] }
  0x3a   :  { %538 = vmatprep.subr.bf16.mxu0 %v694_v0  ;;  %v173_v20 = vld [vmem:[#allocation4 + $0x28] sm:$0xff]  ;;  %v545_v21 = vpack.c.bf16 %v79_v17, %v78_v16  ;;  %v80_v22 = vld [vmem:[#allocation2 + $0x40] sm:$0xff]  ;;  %v174_v25 = vld [vmem:[#allocation4 + $0x30] sm:$0xff] }
  0x3b   :  { %561 = vmatpush3.bf16.msra.mxu1 %v560_v15  ;;  %v81_v23 = vld [vmem:[#allocation2 + $0x48] sm:$0xff]  ;;  %v566_v24 = vpack.c.bf16 %v173_v20, %v172_v19  ;;  %v175_v26 = vld [vmem:[#allocation4 + $0x38] sm:$0xff]  ;;  %v82_v28 = vld [vmem:[#allocation2 + $0x50] sm:$0xff] }
  0x3c   :  { %562 = vmatprep.subr.bf16.mxu1 %v694_v0  ;;  %v548_v27 = vpack.c.bf16 %v81_v23, %v80_v22  ;;  %v83_v29 = vld [vmem:[#allocation2 + $0x58] sm:$0xff]  ;;  %v569_v30 = vpack.c.bf16 %v175_v26, %v174_v25  ;;  %v176_v31 = vld [vmem:[#allocation4 + $0x40] sm:$0xff]  ;;  %v177_v32 = vld [vmem:[#allocation4 + $0x48] sm:$0xff] }
  0x3d   :  { %540 = vmatpush3.bf16.msra.mxu0 %v539_v7  ;;  %v551_v33 = vpack.c.bf16 %v83_v29, %v82_v28  ;;  %v84_v34 = vld [vmem:[#allocation2 + $0x60] sm:$0xff]  ;;  %v85_v35 = vld [vmem:[#allocation2 + $0x68] sm:$0xff]  ;;  %v572_v36 = vpack.c.bf16 %v177_v32, %v176_v31  ;;  %v178_v37 = vld [vmem:[#allocation4 + $0x50] sm:$0xff]  ;;  %v697_v28 = vmov 0  }
  0x3e   :  { %541 = vmatprep.subr.bf16.mxu0 %v694_v0  ;;  %v179_v38 = vld [vmem:[#allocation4 + $0x58] sm:$0xff]  ;;  %v554_v39 = vpack.c.bf16 %v85_v35, %v84_v34  ;;  %v86_v40 = vld [vmem:[#allocation2 + $0x70] sm:$0xff]  ;;  %v180_v43 = vld [vmem:[#allocation4 + $0x60] sm:$0xff]  ;;  %616 = vset.pattern.permute.xlu0 %v697_v28 }
  0x3f   :  { %564 = vmatpush3.bf16.msra.mxu1 %v563_v18  ;;  %v87_v41 = vld [vmem:[#allocation2 + $0x78] sm:$0xff]  ;;  %v575_v42 = vpack.c.bf16 %v179_v38, %v178_v37  ;;  %v181_v44 = vld [vmem:[#allocation4 + $0x68] sm:$0xff]  ;;  %v817_v47 = vld [vmem:[%s847_s0] sm:$0xff] }
  0x40   :  { %565 = vmatprep.subr.bf16.mxu1 %v694_v0  ;;  %v557_v45 = vpack.c.bf16 %v87_v41, %v86_v40  ;;  %v578_v46 = vpack.c.bf16 %v181_v44, %v180_v43  ;;  %v182_v48 = vld [vmem:[#allocation4 + $0x70] sm:$0xff]  ;;  %v183_v49 = vld [vmem:[#allocation4 + $0x78] sm:$0xff]  ;;  %v264_v51 = vld [vmem:[#allocation6] sm:$0xff] }
  0x41   :  { %543 = vmatpush3.bf16.msra.mxu0 %v542_v14  ;;  %v581_v50 = vpack.c.bf16 %v183_v49, %v182_v48  ;;  %v265_v52 = vld [vmem:[#allocation6 + $0x8] sm:$0xff]  ;;  %v266_v53 = vld [vmem:[#allocation6 + $0x10] sm:$0xff]  ;;  %v267_v55 = vld [vmem:[#allocation6 + $0x18] sm:$0xff] }
  0x42   :  { %544 = vmatprep.subr.bf16.mxu0 %v694_v0  ;;  %v584_v54 = vpack.c.bf16 %v265_v52, %v264_v51  ;;  %v587_v56 = vpack.c.bf16 %v267_v55, %v266_v53  ;;  %v268_v57 = vld [vmem:[#allocation6 + $0x20] sm:$0xff]  ;;  %v269_v58 = vld [vmem:[#allocation6 + $0x28] sm:$0xff]  ;;  %v270_v60 = vld [vmem:[#allocation6 + $0x30] sm:$0xff] }
  0x43   :  { %567 = vmatpush3.bf16.msra.mxu1 %v566_v24  ;;  %v590_v59 = vpack.c.bf16 %v269_v58, %v268_v57  ;;  %v271_v61 = vld [vmem:[#allocation6 + $0x38] sm:$0xff]  ;;  %v272_v63 = vld [vmem:[#allocation6 + $0x40] sm:$0xff]  ;;  %v274_v3 = vld [vmem:[#allocation6 + $0x50] sm:$0xff] }
  0x44   :  { %568 = vmatprep.subr.bf16.mxu1 %v694_v0  ;;  %v593_v62 = vpack.c.bf16 %v271_v61, %v270_v60  ;;  %v275_v4 = vld [vmem:[#allocation6 + $0x58] sm:$0xff]  ;;  %v276_v6 = vld [vmem:[#allocation6 + $0x60] sm:$0xff]  ;;  %v277_v7 = vld [vmem:[#allocation6 + $0x68] sm:$0xff] }
  0x45   :  { %546 = vmatpush3.bf16.msra.mxu0 %v545_v21  ;;  %v599_v5 = vpack.c.bf16 %v275_v4, %v274_v3  ;;  %v602_v8 = vpack.c.bf16 %v277_v7, %v276_v6  ;;  %v376_v9 = vld [vmem:[%s850_s3] ss:$0 sm:$0xff]  ;;  %v278_v15 = vld [vmem:[#allocation6 + $0x70] sm:$0xff]  ;;  %v279_v16 = vld [vmem:[#allocation6 + $0x78] sm:$0xff] }
  0x46   :  { %547 = vmatprep.subr.bf16.mxu0 %v694_v0  ;;  %v605_v17 = vpack.c.bf16 %v279_v16, %v278_v15  ;;  %v377_v18 = vld [vmem:[%s852_s5] ss:$0 sm:$0xff] }
  0x47   :  { %570 = vmatpush3.bf16.msra.mxu1 %v569_v30  ;;  %v378_v23 = vld [vmem:[%s854_s7] ss:$0 sm:$0xff] }
  0x48   :  { %571 = vmatprep.subr.bf16.mxu1 %v694_v0  ;;  %v71_v30 = vld [vmem:[%s848_s1] sm:$0xff] }
  0x49   :  { %549 = vmatpush3.bf16.msra.mxu0 %v548_v27 }
  0x4a   :  { %550 = vmatprep.subr.bf16.mxu0 %v694_v0 }
  0x4b   :  { %573 = vmatpush3.bf16.msra.mxu1 %v572_v36 }
  0x4c   :  { %574 = vmatprep.subr.bf16.mxu1 %v694_v0 }
  0x4d   :  { %552 = vmatpush3.bf16.msra.mxu0 %v551_v33 }
  0x4e   :  { %553 = vmatprep.subr.bf16.mxu0 %v694_v0 }
  0x4f   :  { %576 = vmatpush3.bf16.msra.mxu1 %v575_v42 }
  0x50   :  { %577 = vmatprep.subr.bf16.mxu1 %v694_v0 }
  0x51   :  { %555 = vmatpush3.bf16.msra.mxu0 %v554_v39 }
  0x52   :  { %556 = vmatprep.subr.bf16.mxu0 %v694_v0 }
  0x53   :  { %579 = vmatpush3.bf16.msra.mxu1 %v578_v46 }
  0x54   :  { %580 = vmatprep.subr.bf16.mxu1 %v694_v0 }
  0x55   :  { %558 = vmatpush3.bf16.msra.mxu0 %v557_v45 }
  0x56   :  { %583 = vmatprep.subr.bf16.mxu0 %v694_v0 }
  0x57   :  { %582 = vmatpush3.bf16.msra.mxu1 %v581_v50 }
  0x58   :  { %463 = vmatmul.mubr.f32.vlgmr.msra.gmra.mrb[0].mxu0 %v817_v47 }
  0x59   :  { %532 = vmatprep.mubr.msk.f32.mxu0 %vm695_vm0, %v696_v1  ;;  %585 = vmatpush3.bf16.msra.mxu0 %v584_v54  ;;  %v273_v1 = vld [vmem:[#allocation6 + $0x48] sm:$0xff] }
  0x5a   :  { %586 = vmatprep.subr.bf16.mxu0 %v694_v0  ;;  %v596_v2 = vpack.c.bf16 %v273_v1, %v272_v63 }
  0x5d   :  { %588 = vmatpush3.bf16.msra.mxu0 %v587_v56 }
  0x5e   :  { %589 = vmatprep.subr.bf16.mxu0 %v694_v0 }
  0x61   :  { %591 = vmatpush3.bf16.msra.mxu0 %v590_v59 }
  0x62   :  { %592 = vmatprep.subr.bf16.mxu0 %v694_v0 }
  0x65   :  { %594 = vmatpush3.bf16.msra.mxu0 %v593_v62 }
  0x66   :  { %595 = vmatprep.subr.bf16.mxu0 %v694_v0 }
  0x69   :  { %597 = vmatpush3.bf16.msra.mxu0 %v596_v2 }
  0x6a   :  { %598 = vmatprep.subr.bf16.mxu0 %v694_v0 }
  0x6d   :  { %600 = vmatpush3.bf16.msra.mxu0 %v599_v5 }
  0x6e   :  { %601 = vmatprep.subr.bf16.mxu0 %v694_v0 }
  0x71   :  { %603 = vmatpush3.bf16.msra.mxu0 %v602_v8 }
  0x72   :  { %604 = vmatprep.subr.bf16.mxu0 %v694_v0 }
  0x75   :  { %606 = vmatpush3.bf16.msra.mxu0 %v605_v17 }
 0x12b   :  { %v161_v10 = vpop.f32.mrb[0].mxu0 }
 0x12c   :  { %v162_v11 = vadd.f32 %v376_v9, %v161_v10  ;;  %v464_v12 = vpop.f32.mrb[1].mxu0 }
 0x12e   :  { %v166_v13 = vmul.f32 0.2, %v162_v11  ;;  %vm165_vm1 = vcmp.gt.f32.partialorder %v162_v11, 0.0 }
 0x130   :  { %v167_v14 = vsel %vm165_vm1, %v162_v11, %v166_v13 }
 0x131   :  { %498 = vmatmul.mubr.f32.vlgmr.msra.gmra.mrb[0].mxu1 %v167_v14 }
 0x204   :  { %v257_v0 = vpop.f32.mrb[0].mxu1 }
 0x205   :  { %v258_v19 = vadd.f32 %v377_v18, %v257_v0  ;;  %v499_v20 = vpop.f32.mrb[1].mxu1 }
 0x207   :  { %vm261_vm2 = vcmp.gt.f32.partialorder %v258_v19, 0.0  ;;  %v262_v21 = vmul.f32 0.2, %v258_v19 }
 0x209   :  { %v263_v22 = vsel %vm261_vm2, %v258_v19, %v262_v21 }
 0x20a   :  { %533 = vmatmul.mubr.f32.vlgmr.msra.gmra.mrb[2].mxu0 %v263_v22 }
 0x2dd   :  { %v353_v24 = vpop.f32.mrb[2].mxu0 }
 0x2de   :  { %v354_v25 = vadd.f32 %v378_v23, %v353_v24  ;;  %v534_v26 = vpop.f32.mrb[3].mxu0 }
 0x2e0   :  { %v357_v27 = vmul.f32 %v354_v25, %v354_v25 }
 0x2e2   :  { %358 = vadd.xlane.f32.xlu0 %v357_v27 }
 0x36f   :  { %v359_v29 = vpop.xlane.xlu0 %358 }
 0x370   :  { %617 = vrsqrt.f32 %v359_v29 }
 0x37a   :  { %v618_v31 = vpop.eup %617 }
 0x37b   :  { %v361_v32 = vmul.f32 %v618_v31, %v71_v30 }
 0x37d   :  { %364 = vperm.xlu0 %616, %v361_v32  }
 0x3fc   :  { %v365_v33 = vpop.permute.xlu0 %364 }
 0x3fd   :  { %v367_v34 = vmul.f32 %v365_v33, %v354_v25 }
 0x3ff   :  { %v368_v35 = vadd.f32 %v367_v34, %v817_v47 }
 0x401   :  { %369 = vst [vmem:[%s855_s8] sm:$0xff] %v368_v35 }
 0x402   :  { %374 = vsyncpa [#allocation3], 1 }
 0x403   :  { %375 = vsyncpa [#allocation5], 1 }

</bundles_post_ra>
